<compile_context>
chip_gen: v7x
topology: tpu7x:2x2x1
jax: 0.10.0
libtpu: 0.0.40
codegen_flags: <defaults>
</compile_context>

<pallas_src>
import math

import jax
import jax.numpy as jnp
import numpy as np
from jax.experimental import pallas as pl
from jax.experimental.pallas import tpu as pltpu

LANE = 128
# ~2 MiB of f32 input per block (4096 x 128 when lane-dense).
_BLOCK_ELEMS = 4096 * LANE


def _integerfy_kernel(x_ref, o_ref):
    # Cast to f32 inside the kernel (free VALU op) so the input streams from HBM in
    # its original dtype. (x * 255) cast to int truncates toward zero, matching
    # torch's float->int conversion; then subtract 1.
    x = x_ref[...].astype(jnp.float32)
    o_ref[...] = (x * jnp.float32(255.0)).astype(jnp.int32) - 1


def _round_up(n, m):
    return -(-n // m) * m


@jax.jit
def integerfy(seg_mask):
    """JAX/Pallas equivalent of Integerfy.forward (returns int32, see TODO above)."""
    squeezed = jnp.squeeze(seg_mask)
    out_shape = squeezed.shape
    total = int(math.prod(out_shape)) if out_shape else 1

    # Pick a 2-D view with NO padding (reshapes are metadata-only under jit):
    #   * lane-dense (total/128, 128) slab when the element count is 128-aligned;
    #   * otherwise keep the natural trailing dim (full-array last dim is exempt
    #     from the (8,128) divisibility rule), avoiding pad / un-pad HBM passes.
    if total % LANE == 0:
        rows, cols = total // LANE, LANE
    else:
        cols = out_shape[-1] if out_shape else 1
        rows = total // cols
    # TODO(synk): a huge 1-D, non-128-aligned mask would produce one oversized
    # block here; irrelevant for (B,1,H,W) segmentation masks.
    x2d = squeezed.reshape(rows, cols)

    # Block sizing: ~2 MiB of input per block, block rows a multiple of 8 (or the
    # full row extent). Partial tail blocks are handled by Pallas (padded reads,
    # masked writes), so no host-side padding is needed.
    block_rows = min(rows, max(1, _BLOCK_ELEMS // cols))
    if block_rows < rows:
        block_rows = max(8, (block_rows // 8) * 8)
    elif rows > 8:
        # Keep at least two tiles so both v7x TensorCores stream.
        block_rows = _round_up(pl.cdiv(rows, 2), 8)
    # else: single full-array block (exempt from the (8,128) rule).

    grid = (pl.cdiv(rows, block_rows),)

    out2d = pl.pallas_call(
        _integerfy_kernel,
        out_shape=jax.ShapeDtypeStruct((rows, cols), jnp.int32),
        grid_spec=pltpu.PrefetchScalarGridSpec(
            num_scalar_prefetch=0,
            grid=grid,
            in_specs=[pl.BlockSpec((block_rows, cols), lambda i: (i, 0))],
            out_specs=pl.BlockSpec((block_rows, cols), lambda i: (i, 0)),
        ),
        compiler_params=pltpu.CompilerParams(
            dimension_semantics=("parallel",),  # v7x: split tiles across both TCs
        ),
    )(x2d)

    return out2d.reshape(out_shape)


def _reference(seg_mask_np):
    x = np.asarray(seg_mask_np, dtype=np.float32).squeeze()
    return (x * np.float32(255.0)).astype(np.int64) - 1


if __name__ == "__main__":
    key = jax.random.PRNGKey(0)
    k1, k2, k3 = jax.random.split(key, 3)

    # Segmentation mask loaded as float in [0, 1] with a singleton channel: (B, 1, H, W).
    seg_mask = jax.random.uniform(k1, (2, 1, 16, 16), dtype=jnp.float32)
    out = jax.block_until_ready(integerfy(seg_mask))
    ref = _reference(seg_mask)
    assert out.shape == ref.shape, (out.shape, ref.shape)
    np.testing.assert_array_equal(np.asarray(out, dtype=np.int64), ref)

    # Ragged (non-128-aligned) size: exercises the natural-last-dim, partial-tail path.
    seg_mask2 = jax.random.uniform(k2, (3, 1, 7, 11), dtype=jnp.float32)
    out2 = jax.block_until_ready(integerfy(seg_mask2))
    ref2 = _reference(seg_mask2)
    assert out2.shape == ref2.shape, (out2.shape, ref2.shape)
    np.testing.assert_array_equal(np.asarray(out2, dtype=np.int64), ref2)

    # Lane-aligned, multi-tile path (grid >= 2 for megacore).
    seg_mask3 = jax.random.uniform(k3, (2, 1, 64, 64), dtype=jnp.float32)
    out3 = jax.block_until_ready(integerfy(seg_mask3))
    ref3 = _reference(seg_mask3)
    assert out3.shape == ref3.shape, (out3.shape, ref3.shape)
    np.testing.assert_array_equal(np.asarray(out3, dtype=np.int64), ref3)

    print("KERNEL_OK")
</pallas_src>

<mosaic_0001>
module attributes {stable_mosaic.version = 11 : i64} {
  func.func @_integerfy_kernel(%arg0: i32, %arg1: memref<4x128xf32, #tpu.memory_space<vmem>>, %arg2: memref<4x128xi32, #tpu.memory_space<vmem>>) attributes {dimension_semantics = [#tpu.dimension_semantics<parallel>], iteration_bounds = array<i64: 1>, scalar_prefetch = 0 : i64, scratch_operands = 0 : i64, tpu.core_type = #tpu.core_type<tc>, window_params = [{transform_indices = @transform_0, window_bounds = array<i64: 4, 128>}, {transform_indices = @transform_1, window_bounds = array<i64: 4, 128>}]} {
    %c0 = arith.constant 0 : index
    %c0_0 = arith.constant 0 : index
    %0 = vector.load %arg1[%c0, %c0_0] : memref<4x128xf32, #tpu.memory_space<vmem>>, vector<4x128xf32>
    %cst = arith.constant 2.550000e+02 : f32
    %1 = vector.broadcast %cst : f32 to vector<4x128xf32>
    %2 = arith.mulf %0, %1 : vector<4x128xf32>
    %3 = arith.fptosi %2 : vector<4x128xf32> to vector<4x128xi32>
    %c1_i32 = arith.constant 1 : i32
    %4 = vector.broadcast %c1_i32 : i32 to vector<4x128xi32>
    %5 = arith.subi %3, %4 : vector<4x128xi32>
    %c0_1 = arith.constant 0 : index
    %c0_2 = arith.constant 0 : index
    %6 = vector.load %arg2[%c0_1, %c0_2] : memref<4x128xi32, #tpu.memory_space<vmem>>, vector<4x128xi32>
    tpu.vector_store %arg2[%c0_1, %c0_2], %5 {strides = array<i32>} : memref<4x128xi32, #tpu.memory_space<vmem>>, vector<4x128xi32>,
    return
  }
  func.func @transform_0(%arg0: i32) -> (i32, i32) {
    %c0_i32 = arith.constant 0 : i32
    %c0_i32_0 = arith.constant 0 : i32
    return %arg0, %c0_i32 : i32, i32
  }
  func.func @transform_1(%arg0: i32) -> (i32, i32) {
    %c0_i32 = arith.constant 0 : i32
    %c0_i32_0 = arith.constant 0 : i32
    return %arg0, %c0_i32 : i32, i32
  }
}

</mosaic_0001>

<bundles_post_ra>
// kernel: squeeze.1
= control target key start
LH: loop header
LB: loop body
LE: loop exit
PB: predicated region body
PF: predicated region fallthrough
CT: control target
= control target key end

     0   :  { %2 = vsyncpa [#allocation1], 0  ;;  %s96_s6 = smov [#allocation0]   ;;  %s129_s0 = inlined_call_operand.hbm [shape: f32[2,1,16,16], index: 0, kind: input, shape index: {}]   ;;  %s130_s1 = inlined_call_operand.vmem [shape: f32[4,128], index: 1, kind: output, shape index: {}]  }
   0x1   :  { %s7_s7 = sshll.u32 %s96_s6, 4  ;;  %s72_s10 = scalar_lea.hbm %s129_s0, 512  ;;  %s8_s7 = int_to_ptr.vmem [resolvable:$true] %s7_s7 }
   0x2   :  { %p73_p0 = scmp.ne.s32.totalorder %s129_s0, %s72_s10  ;;  %p76_p1 = scmp.lt.u32.totalorder %s72_s10, %s129_s0 }
   0x4   :  { %p78_p2 = pnand %p76_p1, %p73_p0 }
   0x6   :  { %81 = shalt.err (!%p78_p2)
}
   0x7   :  { %s82_s15 = scalar_lea.vmem %s8_s7, 512  ;;  %p87_p4 = scmp.lt.s32.totalorder %s8_s7, %s8_s7 }
   0x8   :  { %p83_p3 = scmp.ne.s32.totalorder %s8_s7, %s82_s15  ;;  %p88_p5 = scmp.lt.s32.totalorder %s82_s15, %s82_s15 }
   0xa   :  { %p89_p6 = por %p88_p5, %p87_p4 }
   0xc   :  { %p90_p7 = pnand %p89_p6, %p83_p3 }
   0xe   :  { %93 = shalt.err (!%p90_p7)
}
   0xf   :  { %10 = dma.hbm_to_vmem [thread:$0]  %s129_s0, 512, %s8_s7, [#allocation1]  }
  0x10   :  { %94 = dma.done.wait [#allocation1], 512  }
  0x11   :  { %95 = vsyncadd [#allocation1], 4294966784  ;;  %v16_v0 = vld [vmem:[#allocation0 + $0x7] ss:$8 sm:$0xf]   ;;  %s97_s0 = smov 112  }
  0x12   :  { %v28_v1 = vld [vmem:[#allocation0 + $0x5] ss:$8 sm:$0xf]   ;;  %17 = vrot.lane.b32.xlu0 %v16_v0, %s97_s0  ;;  %s98_s18 = smov 80   ;;  %vm13_vm0 = vcmask 130048   ;;  %s99_s19 = smov 96  }
  0x13   :  { %29 = vrot.lane.b32.xlu1 %v28_v1, %s98_s18  ;;  %v22_v2 = vld [vmem:[#allocation0 + $0x6] ss:$8 sm:$0xf]   ;;  %v34_v3 = vld [vmem:[#allocation0 + $0x4] ss:$8 sm:$0xf]  }
  0x14   :  { %v12_v4 = vld [vmem:[#allocation0] ss:$8 sm:$0xf]   ;;  %s100_s20 = smov 64   ;;  %s101_s21 = smov 48   ;;  %vm19_vm1 = vcmask 1048448  }
  0x15   :  { %14 = vst.msk [vmem:[#allocation2] sm:$0xf] %vm13_vm0, %v12_v4   ;;  %v40_v5 = vld [vmem:[#allocation0 + $0x3] ss:$8 sm:$0xf]   ;;  %s102_s22 = smov 32  }
  0x16   :  { %23 = vrot.lane.b32.xlu0 %v22_v2, %s99_s19  ;;  %v46_v6 = vld [vmem:[#allocation0 + $0x2] ss:$8 sm:$0xf]   ;;  %v52_v7 = vld [vmem:[#allocation0 + $0x1] ss:$8 sm:$0xf]  }
  0x17   :  { %35 = vrot.lane.b32.xlu1 %v34_v3, %s100_s20  ;;  %s103_s23 = smov 16   ;;  %vm25_vm2 = vcmask 917248   ;;  %vm31_vm3 = vcmask 786048   ;;  %vm37_vm4 = vcmask 654848   ;;  %vm43_vm5 = vcmask 523648  }
  0x18   :  { %vm49_vm6 = vcmask 392448   ;;  %vm55_vm7 = vcmask 261248  }
  0x1a   :  { %41 = vrot.lane.b32.xlu0 %v40_v5, %s101_s21 }
  0x1b   :  { %47 = vrot.lane.b32.xlu1 %v46_v6, %s102_s22 }
  0x1e   :  { %53 = vrot.lane.b32.xlu0 %v52_v7, %s103_s23 }
  0x84   :  { %v18_v8 = vpop.permute.xlu0 %17  }
  0x85   :  { %v30_v9 = vpop.permute.xlu1 %29   ;;  %20 = vst.msk [vmem:[#allocation2] sm:$0xf] %vm19_vm1, %v18_v8  }
  0x88   :  { %v24_v10 = vpop.permute.xlu0 %23  }
  0x89   :  { %v36_v11 = vpop.permute.xlu1 %35   ;;  %26 = vst.msk [vmem:[#allocation2] sm:$0xf] %vm25_vm2, %v24_v10  }
  0x8a   :  { %32 = vst.msk [vmem:[#allocation2] sm:$0xf] %vm31_vm3, %v30_v9  }
  0x8b   :  { %38 = vst.msk [vmem:[#allocation2] sm:$0xf] %vm37_vm4, %v36_v11  }
  0x8c   :  { %v42_v12 = vpop.permute.xlu0 %41  }
  0x8d   :  { %v48_v13 = vpop.permute.xlu1 %47   ;;  %44 = vst.msk [vmem:[#allocation2] sm:$0xf] %vm43_vm5, %v42_v12  }
  0x8e   :  { %50 = vst.msk [vmem:[#allocation2] sm:$0xf] %vm49_vm6, %v48_v13  }
  0x90   :  { %v54_v14 = vpop.permute.xlu0 %53  }
  0x91   :  { %56 = vst.msk [vmem:[#allocation2] sm:$0xf] %vm55_vm7, %v54_v14  }
  0x98   :  { %v60_v15 = vld [vmem:[#allocation2] sm:$0xf] }
  0x99   :  { %62 = vst [vmem:[%s130_s1] sm:$0xf] %v60_v15 }
  0x9a   :  { %63 = vsyncpa [#allocation1], 1 }

// kernel: integerfy.1
= control target key start
LH: loop header
LB: loop body
LE: loop exit
PB: predicated region body
PF: predicated region fallthrough
CT: control target
= control target key end

     0   :  { %s36_s0 = inlined_call_operand.vmem [shape: f32[4,128], index: 0, kind: input, shape index: {}]   ;;  %s37_s1 = inlined_call_operand.vmem [shape: s32[4,128], index: 1, kind: output, shape index: {}]  }
   0x1   :  { %v8_v0 = vld [vmem:[%s36_s0] sm:$0xf] }
   0x2   :  { %v9_v1 = vmul.f32 255.0, %v8_v0 }
   0x4   :  { %v18_v2 = vtrunc.f32 %v9_v1 }
   0x6   :  { %v19_v3 = vcvt.f32.s32 %v18_v2 }
   0x8   :  { %v17_v4 = vadd.s32 4294967295, %v19_v3 }
   0xa   :  { %12 = vst [vmem:[%s37_s1] sm:$0xf] %v17_v4 }

</bundles_post_ra>
